<compile_context>
chip_gen: v6e
topology: v6e:2x2x1
jax: 0.10.0
libtpu: 0.0.40
codegen_flags: <defaults>
</compile_context>

<pallas_src>
import jax
import jax.numpy as jnp
from jax.experimental import pallas as pl
from jax.experimental.pallas import tpu as pltpu


def drr_ave_kernel(w_ref, b_ref, user_ref, item_ref, out_ref):
    # w_ref:    (5,) f32 SMEM          - Conv1d weight (flattened)
    # b_ref:    (1,) f32 SMEM          - Conv1d bias
    # user_ref: (TR, LANE) f32 VMEM    - user embedding slab
    # item_ref: (5, TR, LANE) f32 VMEM - item embeddings, channel-major
    # out_ref:  (3, TR, LANE) f32 VMEM - [user, user*drr, drr] slabs
    user = user_ref[...]
    # Conv1d(in=5, out=1, k=1): weighted sum over the 5 channels + bias.
    drr = (w_ref[0] * item_ref[0]
           + w_ref[1] * item_ref[1]
           + w_ref[2] * item_ref[2]
           + w_ref[3] * item_ref[3]
           + w_ref[4] * item_ref[4]) + b_ref[0]
    out_ref[0] = user          # pass-through slab (keeps concat fused in-kernel)
    out_ref[1] = user * drr    # mult
    out_ref[2] = drr           # drr_ave


def drr_ave_state_representation(user_embed, item_embed, conv_w, conv_b,
                                 *, block_rows=64, max_lane=512):
    """user_embed: (B, D) f32, item_embed: (B, 5, D) f32,
    conv_w: (1, 5, 1) f32 (Conv1d weight), conv_b: (1,) f32 (Conv1d bias).
    Returns (B, 3*D) == concat([user, user*drr, drr], axis=-1)."""
    B, D = user_embed.shape
    assert item_embed.shape == (B, 5, D), item_embed.shape
    N = B * D

    # Lane width: a multiple of 128, as large as the problem allows.
    lane = max_lane
    while lane > 128 and N < lane:
        lane //= 2                      # 512 -> 256 -> 128, all multiples of 128

    rows = pl.cdiv(N, lane)
    if rows <= block_rows:
        block_rows = rows               # one grid step; full-rows block is legal
        rows_padded = rows
    else:
        rows_padded = pl.cdiv(rows, block_rows) * block_rows
    n_pad = rows_padded * lane
    num_blocks = rows_padded // block_rows

    w_flat = conv_w.reshape(5).astype(jnp.float32)
    b_flat = conv_b.reshape(1).astype(jnp.float32)

    # Lane-dense, channel-major views (wrapper-side layout plumbing).
    user_flat = user_embed.reshape(N).astype(jnp.float32)
    item_flat = jnp.transpose(item_embed.astype(jnp.float32), (1, 0, 2)).reshape(5, N)
    if n_pad != N:
        user_flat = jnp.pad(user_flat, (0, n_pad - N))
        item_flat = jnp.pad(item_flat, ((0, 0), (0, n_pad - N)))
    user2d = user_flat.reshape(rows_padded, lane)
    item3d = item_flat.reshape(5, rows_padded, lane)

    out3d = pl.pallas_call(
        drr_ave_kernel,
        out_shape=jax.ShapeDtypeStruct((3, rows_padded, lane), jnp.float32),
        grid_spec=pltpu.PrefetchScalarGridSpec(
            num_scalar_prefetch=0,
            grid=(num_blocks,),
            in_specs=[
                pl.BlockSpec(memory_space=pltpu.MemorySpace.SMEM),          # conv weights
                pl.BlockSpec(memory_space=pltpu.MemorySpace.SMEM),          # conv bias
                pl.BlockSpec((block_rows, lane), lambda i: (i, 0)),         # user
                pl.BlockSpec((5, block_rows, lane), lambda i: (0, i, 0)),   # item
            ],
            out_specs=pl.BlockSpec((3, block_rows, lane), lambda i: (0, i, 0)),
        ),
        compiler_params=pltpu.CompilerParams(
            dimension_semantics=("parallel",),   # lets v7x shard rows over its 2 TCs
        ),
    )(w_flat, b_flat, user2d, item3d)

    # (3, rows_padded, lane) -> (3, N) -> (B, 3, D) -> (B, 3*D)
    out_flat = out3d.reshape(3, n_pad)[:, :N]
    return jnp.transpose(out_flat.reshape(3, B, D), (1, 0, 2)).reshape(B, 3 * D)


if __name__ == "__main__":
    key = jax.random.PRNGKey(0)
    embedding_dim = 32
    user_count = 10
    item_count = 20
    batch = 2

    k1, k2, k3, k4, k5 = jax.random.split(key, 5)

    # Deterministic parameter init mirroring the module's __init__:
    #   nn.Embedding weights ~ N(0, 0.01), Conv1d weight ~ U[0, 1), bias = 0.
    user_table = 0.01 * jax.random.normal(k1, (user_count, embedding_dim), jnp.float32)
    item_table = 0.01 * jax.random.normal(k2, (item_count, embedding_dim), jnp.float32)
    conv_w = jax.random.uniform(k3, (1, 5, 1), jnp.float32)
    conv_b = jnp.zeros((1,), jnp.float32)

    # Build forward inputs by gathering from the embedding tables.
    user_ids = jax.random.randint(k4, (batch,), 0, user_count)
    item_ids = jax.random.randint(k5, (batch, 5), 0, item_count)
    user_embed = user_table[user_ids]          # (B, D)
    item_embed = item_table[item_ids]          # (B, 5, D)

    out = drr_ave_state_representation(user_embed, item_embed, conv_w, conv_b)
    out = jax.block_until_ready(out)

    # Pure-JAX reference for verification.
    drr_ref = jnp.einsum('bcd,c->bd', item_embed, conv_w.reshape(5)) + conv_b[0]
    ref = jnp.concatenate([user_embed, user_embed * drr_ref, drr_ref], axis=-1)

    assert out.shape == (batch, 3 * embedding_dim), out.shape
    assert jnp.allclose(out, ref, atol=1e-6, rtol=1e-5), float(jnp.max(jnp.abs(out - ref)))
    print("KERNEL_OK")
</pallas_src>

<mosaic_0001>
module attributes {stable_mosaic.version = 11 : i64} {
  func.func @drr_ave_kernel(%arg0: i32, %arg1: memref<5xf32, #tpu.memory_space<smem>>, %arg2: memref<1xf32, #tpu.memory_space<smem>>, %arg3: memref<1x128xf32, #tpu.memory_space<vmem>>, %arg4: memref<5x1x128xf32, #tpu.memory_space<vmem>>, %arg5: memref<3x1x128xf32, #tpu.memory_space<vmem>>) attributes {dimension_semantics = [#tpu.dimension_semantics<parallel>], iteration_bounds = array<i64: 1>, scalar_prefetch = 0 : i64, scratch_operands = 0 : i64, tpu.core_type = #tpu.core_type<tc>, window_params = [{transform_indices = @transform_0, window_bounds = array<i64: 5>}, {transform_indices = @transform_1, window_bounds = array<i64: 1>}, {transform_indices = @transform_2, window_bounds = array<i64: 1, 128>}, {transform_indices = @transform_3, window_bounds = array<i64: 5, 1, 128>}, {transform_indices = @transform_4, window_bounds = array<i64: 3, 1, 128>}]} {
    %c0 = arith.constant 0 : index
    %c0_0 = arith.constant 0 : index
    %0 = vector.load %arg3[%c0, %c0_0] : memref<1x128xf32, #tpu.memory_space<vmem>>, vector<1x128xf32>
    %c0_1 = arith.constant 0 : index
    %1 = memref.load %arg1[%c0_1] : memref<5xf32, #tpu.memory_space<smem>>
    %c0_2 = arith.constant 0 : index
    %c0_3 = arith.constant 0 : index
    %c0_4 = arith.constant 0 : index
    %2 = vector.load %arg4[%c0_2, %c0_3, %c0_4] : memref<5x1x128xf32, #tpu.memory_space<vmem>>, vector<1x1x128xf32>
    %3 = vector.shape_cast %2 : vector<1x1x128xf32> to vector<1x128xf32>
    %4 = vector.broadcast %1 : f32 to vector<1x128xf32>
    %5 = arith.mulf %4, %3 : vector<1x128xf32>
    %c1 = arith.constant 1 : index
    %6 = memref.load %arg1[%c1] : memref<5xf32, #tpu.memory_space<smem>>
    %c1_5 = arith.constant 1 : index
    %c0_6 = arith.constant 0 : index
    %c0_7 = arith.constant 0 : index
    %7 = vector.load %arg4[%c1_5, %c0_6, %c0_7] : memref<5x1x128xf32, #tpu.memory_space<vmem>>, vector<1x1x128xf32>
    %8 = vector.shape_cast %7 : vector<1x1x128xf32> to vector<1x128xf32>
    %9 = vector.broadcast %6 : f32 to vector<1x128xf32>
    %10 = arith.mulf %9, %8 : vector<1x128xf32>
    %11 = arith.addf %5, %10 : vector<1x128xf32>
    %c2 = arith.constant 2 : index
    %12 = memref.load %arg1[%c2] : memref<5xf32, #tpu.memory_space<smem>>
    %c2_8 = arith.constant 2 : index
    %c0_9 = arith.constant 0 : index
    %c0_10 = arith.constant 0 : index
    %13 = vector.load %arg4[%c2_8, %c0_9, %c0_10] : memref<5x1x128xf32, #tpu.memory_space<vmem>>, vector<1x1x128xf32>
    %14 = vector.shape_cast %13 : vector<1x1x128xf32> to vector<1x128xf32>
    %15 = vector.broadcast %12 : f32 to vector<1x128xf32>
    %16 = arith.mulf %15, %14 : vector<1x128xf32>
    %17 = arith.addf %11, %16 : vector<1x128xf32>
    %c3 = arith.constant 3 : index
    %18 = memref.load %arg1[%c3] : memref<5xf32, #tpu.memory_space<smem>>
    %c3_11 = arith.constant 3 : index
    %c0_12 = arith.constant 0 : index
    %c0_13 = arith.constant 0 : index
    %19 = vector.load %arg4[%c3_11, %c0_12, %c0_13] : memref<5x1x128xf32, #tpu.memory_space<vmem>>, vector<1x1x128xf32>
    %20 = vector.shape_cast %19 : vector<1x1x128xf32> to vector<1x128xf32>
    %21 = vector.broadcast %18 : f32 to vector<1x128xf32>
    %22 = arith.mulf %21, %20 : vector<1x128xf32>
    %23 = arith.addf %17, %22 : vector<1x128xf32>
    %c4 = arith.constant 4 : index
    %24 = memref.load %arg1[%c4] : memref<5xf32, #tpu.memory_space<smem>>
    %c4_14 = arith.constant 4 : index
    %c0_15 = arith.constant 0 : index
    %c0_16 = arith.constant 0 : index
    %25 = vector.load %arg4[%c4_14, %c0_15, %c0_16] : memref<5x1x128xf32, #tpu.memory_space<vmem>>, vector<1x1x128xf32>
    %26 = vector.shape_cast %25 : vector<1x1x128xf32> to vector<1x128xf32>
    %27 = vector.broadcast %24 : f32 to vector<1x128xf32>
    %28 = arith.mulf %27, %26 : vector<1x128xf32>
    %29 = arith.addf %23, %28 : vector<1x128xf32>
    %c0_17 = arith.constant 0 : index
    %30 = memref.load %arg2[%c0_17] : memref<1xf32, #tpu.memory_space<smem>>
    %31 = vector.broadcast %30 : f32 to vector<1x128xf32>
    %32 = arith.addf %29, %31 : vector<1x128xf32>
    %c0_18 = arith.constant 0 : index
    %c0_19 = arith.constant 0 : index
    %c0_20 = arith.constant 0 : index
    %33 = vector.load %arg5[%c0_18, %c0_19, %c0_20] : memref<3x1x128xf32, #tpu.memory_space<vmem>>, vector<1x1x128xf32>
    %34 = vector.shape_cast %33 : vector<1x1x128xf32> to vector<1x128xf32>
    %35 = vector.shape_cast %0 : vector<1x128xf32> to vector<1x1x128xf32>
    tpu.vector_store %arg5[%c0_18, %c0_19, %c0_20], %35 {strides = array<i32>} : memref<3x1x128xf32, #tpu.memory_space<vmem>>, vector<1x1x128xf32>,
    %36 = arith.mulf %0, %32 : vector<1x128xf32>
    %c1_21 = arith.constant 1 : index
    %c0_22 = arith.constant 0 : index
    %c0_23 = arith.constant 0 : index
    %37 = vector.load %arg5[%c1_21, %c0_22, %c0_23] : memref<3x1x128xf32, #tpu.memory_space<vmem>>, vector<1x1x128xf32>
    %38 = vector.shape_cast %37 : vector<1x1x128xf32> to vector<1x128xf32>
    %39 = vector.shape_cast %36 : vector<1x128xf32> to vector<1x1x128xf32>
    tpu.vector_store %arg5[%c1_21, %c0_22, %c0_23], %39 {strides = array<i32>} : memref<3x1x128xf32, #tpu.memory_space<vmem>>, vector<1x1x128xf32>,
    %c2_24 = arith.constant 2 : index
    %c0_25 = arith.constant 0 : index
    %c0_26 = arith.constant 0 : index
    %40 = vector.load %arg5[%c2_24, %c0_25, %c0_26] : memref<3x1x128xf32, #tpu.memory_space<vmem>>, vector<1x1x128xf32>
    %41 = vector.shape_cast %40 : vector<1x1x128xf32> to vector<1x128xf32>
    %42 = vector.shape_cast %32 : vector<1x128xf32> to vector<1x1x128xf32>
    tpu.vector_store %arg5[%c2_24, %c0_25, %c0_26], %42 {strides = array<i32>} : memref<3x1x128xf32, #tpu.memory_space<vmem>>, vector<1x1x128xf32>,
    return
  }
  func.func @transform_0(%arg0: i32) -> i32 {
    %c0_i32 = arith.constant 0 : i32
    %c0_i32_0 = arith.constant 0 : i32
    return %c0_i32 : i32
  }
  func.func @transform_1(%arg0: i32) -> i32 {
    %c0_i32 = arith.constant 0 : i32
    %c0_i32_0 = arith.constant 0 : i32
    return %c0_i32 : i32
  }
  func.func @transform_2(%arg0: i32) -> (i32, i32) {
    %c0_i32 = arith.constant 0 : i32
    %c0_i32_0 = arith.constant 0 : i32
    return %arg0, %c0_i32 : i32, i32
  }
  func.func @transform_3(%arg0: i32) -> (i32, i32, i32) {
    %c0_i32 = arith.constant 0 : i32
    %c0_i32_0 = arith.constant 0 : i32
    %c0_i32_1 = arith.constant 0 : i32
    return %c0_i32, %arg0, %c0_i32_0 : i32, i32, i32
  }
  func.func @transform_4(%arg0: i32) -> (i32, i32, i32) {
    %c0_i32 = arith.constant 0 : i32
    %c0_i32_0 = arith.constant 0 : i32
    %c0_i32_1 = arith.constant 0 : i32
    return %c0_i32, %arg0, %c0_i32_0 : i32, i32, i32
  }
}

</mosaic_0001>

<bundles_post_ra>
// kernel: tpu_custom_call.1
= control target key start
LH: loop header
LB: loop body
LE: loop exit
PB: predicated region body
PF: predicated region fallthrough
CT: control target
= control target key end

     0   :  { %10 = vsyncpa [#allocation6], 0  ;;  %s222_s0 = inlined_call_operand.hbm [shape: f32[5], index: 0, kind: input, shape index: {}]   ;;  %s223_s1 = inlined_call_operand.<no memory space> [shape: f32[1], index: 1, kind: input, shape index: {}]   ;;  %s224_s2 = inlined_call_operand.hbm [shape: f32[1,128], index: 2, kind: input, shape index: {}]   ;;  %s225_s3 = inlined_call_operand.vmem [shape: f32[5,1,128], index: 3, kind: input, shape index: {}]   ;;  %s226_s4 = inlined_call_operand.hbm [shape: f32[3,1,128], index: 4, kind: output, shape index: {}]  }
   0x1   :  { %11 = vsyncpa [#allocation4], 0 }
   0x2   :  { %12 = vsyncpa [#allocation5], 0  ;;  %s165_s15 = smov [#allocation3]   ;;  %s166_s18 = smov [#allocation7]  }
   0x3   :  { %20 = dma.hbm_to_smem %s222_s0, 16, %s165_s15, [#allocation6]  }
   0x4   :  { %s29_s19 = sshll.u32 %s166_s18, 4  ;;  %s30_s19 = int_to_ptr.vmem [resolvable:$true] %s29_s19 }
   0x5   :  { %s127_s20 = scalar_lea.vmem %s30_s19, 16  ;;  %s131_s21 = scalar_lea.vmem %s30_s19, 32 }
   0x6   :  { %p128_p0 = scmp.ne.s32.totalorder %s30_s19, %s127_s20  ;;  %p132_p1 = scmp.lt.s32.totalorder %s30_s19, %s30_s19 }
   0x7   :  { %p133_p2 = scmp.lt.s32.totalorder %s131_s21, %s127_s20 }
   0x9   :  { %p134_p3 = por %p133_p2, %p132_p1 }
   0xb   :  { %p135_p4 = pnand %p134_p3, %p128_p0 }
   0xd   :  { %138 = shalt.err (!%p135_p4)
}
   0xe   :  { %32 = dma.hbm_to_vmem [thread:$0]  %s224_s2, 16, %s30_s19, [#allocation4]  }
   0xf   :  { %159 = dma.done.wait [#allocation6], 16  }
  0x10   :  { %160 = vsyncadd [#allocation6], 4294967280 }
  0x11   :  { %161 = dma.done.wait [#allocation4], 16  }
  0x12   :  { %162 = vsyncadd [#allocation4], 4294967280 }
  0x13   :  { %41 = sfence }
  0x14   :  { %v42_v0 = vld [vmem:[#allocation7] sm:$0x1]  ;;  %s43_s0 = sld [smem:[#allocation3]]  ;;  %v99_v2 = vld [vmem:[%s225_s3 + $0x1] sm:$0x1]  ;;  %v72_v19 = vstv %s223_s1  ;;  %s167_s13 = smov [#allocation8]  }
  0x15   :  { %74 = vst [vmem:[#allocation8] sm:$0x1] %v42_v0  ;;  %s98_s24 = sld [smem:[#allocation3 + $0x1]]  ;;  %v44_v1 = vld [vmem:[%s225_s3] sm:$0x1]  ;;  %s85_s14 = sshll.u32 %s167_s13, 4  ;;  %s86_s14 = int_to_ptr.vmem [resolvable:$true] %s85_s14 }
  0x16   :  { %s100_s25 = sld [smem:[#allocation3 + $0x2]]  ;;  %v101_v4 = vld [vmem:[%s225_s3 + $0x2] sm:$0x1]  ;;  %v103_v7 = vld [vmem:[%s225_s3 + $0x3] sm:$0x1]  ;;  %s139_s15 = scalar_lea.vmem %s86_s14, 48 }
  0x17   :  { %s102_s26 = sld [smem:[#allocation3 + $0x3]]  ;;  %v105_v12 = vld [vmem:[%s225_s3 + $0x4] sm:$0x1]  ;;  %p140_p5 = scmp.ne.s32.totalorder %s86_s14, %s139_s15 }
  0x18   :  { %s104_s29 = sld [smem:[#allocation3 + $0x4]]  ;;  %s143_s3 = scalar_lea.vmem %s86_s14, 64 }
  0x19   :  { %p144_p6 = scmp.lt.s32.totalorder %s86_s14, %s86_s14  ;;  %p145_p7 = scmp.lt.s32.totalorder %s143_s3, %s139_s15 }
  0x1a   :  { %v45_v3 = vstv %s43_s0 }
  0x1b   :  { %v46_v5 = vmul.f32 %v45_v3, %v44_v1  ;;  %v50_v6 = vstv %s98_s24  ;;  %p146_p8 = por %p145_p7, %p144_p6 }
  0x1c   :  { %v51_v8 = vmul.f32 %v99_v2, %v50_v6  ;;  %v56_v9 = vstv %s100_s25 }
  0x1d   :  { %v57_v10 = vmul.f32 %v101_v4, %v56_v9  ;;  %v62_v11 = vstv %s102_s26  ;;  %p147_p9 = pnand %p146_p8, %p140_p5 }
  0x1e   :  { %v52_v13 = vadd.f32 %v51_v8, %v46_v5  ;;  %v63_v14 = vmul.f32 %v103_v7, %v62_v11  ;;  %v68_v15 = vstv %s104_s29 }
  0x1f   :  { %v69_v17 = vmul.f32 %v105_v12, %v68_v15 }
  0x20   :  { %v58_v16 = vadd.f32 %v57_v10, %v52_v13 }
  0x22   :  { %v64_v18 = vadd.f32 %v63_v14, %v58_v16 }
  0x24   :  { %v70_v20 = vadd.f32 %v69_v17, %v64_v18 }
  0x26   :  { %v73_v21 = vadd.f32 %v72_v19, %v70_v20 }
  0x28   :  { %v75_v22 = vmul.f32 %v73_v21, %v42_v0  ;;  %79 = vst [vmem:[#allocation8 + $0x2] sm:$0x1] %v73_v21 }
  0x2a   :  { %77 = vst [vmem:[#allocation8 + $0x1] sm:$0x1] %v75_v22 }
  0x2b   :  { %150 = shalt.err (!%p147_p9)
}
  0x2c   :  { %s168_s16 = smov 16   ;;  %s169_s17 = smov 1  }
  0x2d   :  { %91 = dma.vmem_to_hbm [thread:$0]  %s86_s14, 48, %s226_s4, [#allocation5], %s168_s16, %s168_s16, %s169_s17  }
  0x2e   :  { %163 = dma.done.wait [#allocation5], 48  }
  0x2f   :  { %164 = vsyncadd [#allocation5], 4294967248 }
  0x30   :  { %95 = vsyncpa [#allocation4], 1 }
  0x31   :  { %96 = vsyncpa [#allocation5], 1 }
  0x32   :  { %97 = vsyncpa [#allocation6], 1 }

</bundles_post_ra>
